<compile_context>
chip_gen: v7x
topology: tpu7x:2x2x1
jax: 0.10.0
libtpu: 0.0.40
codegen_flags: <defaults>
</compile_context>

<pallas_src>
import functools

import jax
import jax.numpy as jnp
from jax.experimental import pallas as pl
from jax.experimental.pallas import tpu as pltpu

# Module hyper-parameters (defaults of WGAN_DIV_Loss.__init__)
K_COEF = 2
P_COEF = 6
DIM = 289


def _sq_norm_kernel(grad_ref, out_ref, acc_ref, *,
                    cols, tile_c, steps_per_split, mask_ragged, lane_acc):
    """Grid: (num_splits, steps_per_split).

    grad_ref : (rows, tile_c) streamed tile of the densified gradient.
    out_ref  : (rows, 1) per-row partial sum of squares for this split.
    acc_ref  : (rows, 128) [lane_acc] or (rows, 1) f32 resident accumulator.
    """
    s = pl.program_id(0)
    k = pl.program_id(1)

    @pl.when(k == 0)
    def _init():
        acc_ref[...] = jnp.zeros_like(acc_ref)

    x = grad_ref[...].astype(jnp.float32)                      # (rows, tile_c)

    if mask_ragged:
        # The last tile may hang off the end of the array; the un-DMA'd lanes
        # hold stale data, so zero them (VPU cmp+select, hidden under the
        # multi-microsecond tile DMA).
        rem = cols - (s * steps_per_split + k) * tile_c
        lane = jax.lax.broadcasted_iota(jnp.int32, x.shape, 1)
        x = jnp.where(lane < rem, x, 0.0)

    x2 = x * x

    if lane_acc:
        # Pure-VPU halving tree over lane-aligned chunks (tile_c = 128 * 2^m);
        # keeps the steady-state loop free of XLU reduces and of narrow
        # (rows, 1) read-modify-writes.
        w = x2.shape[1]
        while w > 128:
            half = w // 2
            x2 = x2[:, :half] + x2[:, half:]
            w = half
        acc_ref[...] += x2                                     # (rows, 128)
    else:
        acc_ref[...] += jnp.sum(x2, axis=1, keepdims=True)     # (rows, 1)

    @pl.when(k == pl.num_programs(1) - 1)
    def _finalize():
        # Single cross-lane (XLU) reduce per split; tiny one-time store.
        out_ref[...] = jnp.sum(acc_ref[...], axis=1, keepdims=True)


def _choose_sublane_group(feat):
    """Largest g in {8,4,2,1} dividing the feature count (g=8 -> full-density
    f32 vregs even for batch < 8)."""
    for g in (8, 4, 2, 1):
        if feat % g == 0:
            return g


def _choose_tile_c(rows, cols, itemsize, target_bytes):
    """Lane-dense tile width (power-of-two count of 128-lane chunks), sized so
    one grid step streams ~target_bytes of useful gradient data."""
    rows_pad = max(8, -(-rows // 8) * 8)
    chunks = max(1, target_bytes // (rows_pad * itemsize * 128))
    chunks = 1 << (int(chunks).bit_length() - 1)          # power-of-two floor
    tile_c = chunks * 128
    if tile_c >= cols:
        return cols                                       # single full-width tile
    return tile_c


def wgan_div_row_sq_norms(grad2d, *, sublane_group=None, tile_c=None,
                          num_splits=None, target_tile_bytes=4 << 20):
    """Per-batch-row sum of squares of grad2d (B, F) via a streaming Pallas
    kernel.  Returns (B,) f32."""
    B, F = grad2d.shape
    g = sublane_group if sublane_group is not None else _choose_sublane_group(F)
    assert F % g == 0, "sublane_group must divide the flattened feature size"
    rows, cols = B * g, F // g
    # Free row-major reshape: sublane-densify so vregs/VMEM tiles are full.
    grad2d = jnp.reshape(grad2d, (rows, cols))

    itemsize = jnp.dtype(grad2d.dtype).itemsize
    if tile_c is None:
        # v7x note: at 3.2 TB/s the ~0.35 us per-step overhead covers ~1 MiB,
        # so pass target_tile_bytes=8<<20 there when cols is large enough.
        tile_c = _choose_tile_c(rows, cols, itemsize, target_tile_bytes)
    assert tile_c == cols or tile_c % 128 == 0, \
        "tile_c must be lane-dense (multiple of 128) or cover the full width"

    n_tiles = pl.cdiv(cols, tile_c)
    if num_splits is None:
        # v7x: split the column range across both TensorCores when it divides
        # evenly and rows are sublane-dense; neutral on v5e/v6e (1 TC).
        num_splits = 2 if (n_tiles % 2 == 0 and n_tiles >= 2
                           and rows % 8 == 0) else 1
    assert num_splits >= 1 and n_tiles % num_splits == 0, \
        "num_splits must divide the tile count"
    if num_splits > 1:
        assert rows % 8 == 0, "multi-split output blocks need rows % 8 == 0"
    steps_per_split = n_tiles // num_splits

    mask_ragged = (cols % tile_c) != 0
    chunks = tile_c // 128
    lane_acc = (tile_c % 128 == 0) and (chunks & (chunks - 1) == 0)
    acc_w = 128 if lane_acc else 1

    kernel = functools.partial(
        _sq_norm_kernel, cols=cols, tile_c=tile_c,
        steps_per_split=steps_per_split, mask_ragged=mask_ragged,
        lane_acc=lane_acc)

    out = pl.pallas_call(
        kernel,
        out_shape=jax.ShapeDtypeStruct((num_splits * rows, 1), jnp.float32),
        grid=(num_splits, steps_per_split),
        in_specs=[
            # The gradient streams through VMEM one byte-sized tile per step
            # (double-buffered by the Pallas pipeline), in its native dtype.
            pl.BlockSpec((rows, tile_c),
                         lambda s, k: (0, s * steps_per_split + k)),
        ],
        # Per-split output block, resident across the reduction axis.
        out_specs=pl.BlockSpec((rows, 1), lambda s, k: (s, 0)),
        scratch_shapes=[pltpu.VMEM((rows, acc_w), jnp.float32)],
        compiler_params=pltpu.CompilerParams(
            dimension_semantics=("parallel", "arbitrary"),
            vmem_limit_bytes=32 * 1024 * 1024),
    )(grad2d)

    # (num_splits, B, g) -> per-batch total sum of squares.
    return jnp.sum(jnp.reshape(out, (num_splits, B, g)), axis=(0, 2))


def wgan_div_loss(real_val, fake_val, real_grad, *, k=K_COEF, p=P_COEF, **kw):
    """real_val/fake_val: (B, dim); real_grad: (B, F) = d(real_val)/dy with a
    ones cotangent, flattened.  fake_grad (zeros cotangent) is identically
    zero, contributes nothing, and is never materialized."""
    row_sq = wgan_div_row_sq_norms(real_grad, **kw)               # (B,)
    if p % 2 == 0:
        real_grad_norm = row_sq ** (p // 2)      # integer power: VPU multiplies
    else:
        real_grad_norm = row_sq ** (p / 2.0)     # exact for odd p
    div_gp = jnp.mean(real_grad_norm) * (k / 2.0)
    # The two tiny (B, dim) means fuse for free in the surrounding XLA.
    return -jnp.mean(real_val) + jnp.mean(fake_val) + div_gp


def wgan_div_loss_forward(y, y_hat, disc_w, **kw):
    """Full forward matching the torch module, including the autograd glue.

    y, y_hat : NCHW images (B, C, H, W)
    disc_w   : synthetic discriminator weights (C*H*W, DIM)
    """
    B = y.shape[0]

    def discriminator(x):
        return jnp.reshape(x, (x.shape[0], -1)) @ disc_w           # (B, DIM)

    # torch.autograd.grad has no in-kernel Pallas equivalent; jax.vjp supplies
    # the gradient and the Pallas kernel consumes it.
    real_val, vjp_real = jax.vjp(discriminator, y)
    (real_grad,) = vjp_real(jnp.ones((B, DIM), real_val.dtype))
    fake_val = discriminator(y_hat)     # fake_grad (zeros cotangent) == 0 exactly

    # TODO(synk): fuse the squared-norm reduction into the VJP (stream K-tiles
    # of disc_w through one MXU+VPU kernel) so the (B, F) gradient never
    # round-trips HBM at all — the remaining end-to-end ceiling.
    real_grad_flat = jnp.reshape(real_grad, (B, -1))    # native dtype, no upcast
    return wgan_div_loss(real_val, fake_val, real_grad_flat, **kw)


def _reference_loss(y, y_hat, disc_w, k=K_COEF, p=P_COEF, dim=DIM):
    """Pure-JAX reference mirroring the torch module literally (including the
    provably-zero fake-grad branch)."""
    B = y.shape[0]

    def discriminator(x):
        return jnp.reshape(x, (x.shape[0], -1)) @ disc_w

    real_val, vjp_real = jax.vjp(discriminator, y)
    (real_grad,) = vjp_real(jnp.ones((B, dim), jnp.float32))
    fake_val, vjp_fake = jax.vjp(discriminator, y_hat)
    (fake_grad,) = vjp_fake(jnp.zeros((B, dim), jnp.float32))

    rgn = jnp.sum(jnp.reshape(real_grad, (B, -1)) ** 2, axis=1) ** (p / 2)
    fgn = jnp.sum(jnp.reshape(fake_grad, (B, -1)) ** 2, axis=1) ** (p / 2)
    div_gp = jnp.mean(rgn + fgn) * k / 2
    return -jnp.mean(real_val) + jnp.mean(fake_val) + div_gp


if __name__ == "__main__":
    key = jax.random.PRNGKey(0)
    k_y, k_yh, k_w, k_y2, k_yh2, k_w2 = jax.random.split(key, 6)

    # --- main shape: B=2, C=4, 16x16 -> F = 1024 features -------------------
    B, C, H, W = 2, 4, 16, 16
    F = C * H * W
    y = jax.random.normal(k_y, (B, C, H, W), jnp.float32)
    y_hat = jax.random.normal(k_yh, (B, C, H, W), jnp.float32)
    disc_w = 0.01 * jax.random.normal(k_w, (F, DIM), jnp.float32)

    ref = jax.block_until_ready(_reference_loss(y, y_hat, disc_w))

    # 1) Auto config: sublane-densified to (16, 128), one byte-sized tile.
    loss_auto = jax.block_until_ready(wgan_div_loss_forward(y, y_hat, disc_w))
    assert jnp.allclose(loss_auto, ref, rtol=1e-4, atol=1e-4), (loss_auto, ref)

    # 2) Forced 2-way split: (8, 256) grad, two 128-wide tiles, one per
    #    "parallel" split (v7x two-TC path; runs serially on 1-TC chips).
    loss_split = jax.block_until_ready(
        wgan_div_loss_forward(y, y_hat, disc_w,
                              sublane_group=4, tile_c=128, num_splits=2))
    assert jnp.allclose(loss_split, ref, rtol=1e-4, atol=1e-4), (loss_split, ref)

    # --- ragged shape: B=2, C=3, 16x16 -> F = 768; tile 512 -> masked tail ---
    C3 = 3
    F3 = C3 * H * W
    y3 = jax.random.normal(k_y2, (B, C3, H, W), jnp.float32)
    y_hat3 = jax.random.normal(k_yh2, (B, C3, H, W), jnp.float32)
    disc_w3 = 0.01 * jax.random.normal(k_w2, (F3, DIM), jnp.float32)

    ref3 = jax.block_until_ready(_reference_loss(y3, y_hat3, disc_w3))
    loss_ragged = jax.block_until_ready(
        wgan_div_loss_forward(y3, y_hat3, disc_w3, sublane_group=1, tile_c=512))
    assert jnp.allclose(loss_ragged, ref3, rtol=1e-4, atol=1e-4), (loss_ragged, ref3)

    print("KERNEL_OK")
</pallas_src>

<mosaic_0001>
module attributes {stable_mosaic.version = 11 : i64} {
  func.func @_sq_norm_kernel(%arg0: i32, %arg1: i32, %arg2: memref<16x128xf32, #tpu.memory_space<vmem>>, %arg3: memref<16x1xf32, #tpu.memory_space<vmem>>, %arg4: memref<16x128xf32, #tpu.memory_space<vmem>>) attributes {dimension_semantics = [#tpu.dimension_semantics<parallel>, #tpu.dimension_semantics<arbitrary>], iteration_bounds = array<i64: 1, 1>, scalar_prefetch = 0 : i64, scratch_operands = 1 : i64, tpu.core_type = #tpu.core_type<tc>, window_params = [{transform_indices = @transform_0, window_bounds = array<i64: 16, 128>}, {transform_indices = @transform_1, window_bounds = array<i64: 16, 1>}]} {
    %c0_i32 = arith.constant 0 : i32
    %0 = arith.cmpi eq, %arg1, %c0_i32 : i32
    %1 = arith.extui %0 : i1 to i32
    %c0_i32_0 = arith.constant 0 : i32
    %2 = arith.cmpi ne, %1, %c0_i32_0 : i32
    scf.if %2 {
      %cst = arith.constant 0.000000e+00 : f32
      %11 = vector.broadcast %cst : f32 to vector<16x128xf32>
      %c0_8 = arith.constant 0 : index
      %c0_9 = arith.constant 0 : index
      %12 = vector.load %arg4[%c0_8, %c0_9] : memref<16x128xf32, #tpu.memory_space<vmem>>, vector<16x128xf32>
      tpu.vector_store %arg4[%c0_8, %c0_9], %11 {strides = array<i32>} : memref<16x128xf32, #tpu.memory_space<vmem>>, vector<16x128xf32>,
    } else {
    }
    %c0 = arith.constant 0 : index
    %c0_1 = arith.constant 0 : index
    %3 = vector.load %arg2[%c0, %c0_1] : memref<16x128xf32, #tpu.memory_space<vmem>>, vector<16x128xf32>
    %4 = arith.mulf %3, %3 : vector<16x128xf32>
    %c0_2 = arith.constant 0 : index
    %c0_3 = arith.constant 0 : index
    %5 = vector.load %arg4[%c0_2, %c0_3] : memref<16x128xf32, #tpu.memory_space<vmem>>, vector<16x128xf32>
    %6 = arith.addf %5, %4 : vector<16x128xf32>
    %c0_4 = arith.constant 0 : index
    %c0_5 = arith.constant 0 : index
    %7 = vector.load %arg4[%c0_4, %c0_5] : memref<16x128xf32, #tpu.memory_space<vmem>>, vector<16x128xf32>
    tpu.vector_store %arg4[%c0_4, %c0_5], %6 {strides = array<i32>} : memref<16x128xf32, #tpu.memory_space<vmem>>, vector<16x128xf32>,
    %c0_i32_6 = arith.constant 0 : i32
    %8 = arith.cmpi eq, %arg1, %c0_i32_6 : i32
    %9 = arith.extui %8 : i1 to i32
    %c0_i32_7 = arith.constant 0 : i32
    %10 = arith.cmpi ne, %9, %c0_i32_7 : i32
    scf.if %10 {
      %c0_8 = arith.constant 0 : index
      %c0_9 = arith.constant 0 : index
      %11 = vector.load %arg4[%c0_8, %c0_9] : memref<16x128xf32, #tpu.memory_space<vmem>>, vector<16x128xf32>
      %cst = arith.constant dense<0.000000e+00> : vector<16xf32>
      %12 = vector.multi_reduction <add>, %11, %cst [1] : vector<16x128xf32> to vector<16xf32>
      %13 = vector.shape_cast %12 : vector<16xf32> to vector<16x1xf32>
      %c0_10 = arith.constant 0 : index
      %c0_11 = arith.constant 0 : index
      %14 = vector.load %arg3[%c0_10, %c0_11] : memref<16x1xf32, #tpu.memory_space<vmem>>, vector<16x1xf32>
      tpu.vector_store %arg3[%c0_10, %c0_11], %13 {strides = array<i32>} : memref<16x1xf32, #tpu.memory_space<vmem>>, vector<16x1xf32>,
    } else {
    }
    return
  }
  func.func @transform_0(%arg0: i32, %arg1: i32) -> (i32, i32) {
    %c1_i32 = arith.constant 1 : i32
    %0 = arith.muli %arg0, %c1_i32 : i32
    %1 = arith.addi %0, %arg1 : i32
    %c0_i32 = arith.constant 0 : i32
    %c0_i32_0 = arith.constant 0 : i32
    return %c0_i32, %1 : i32, i32
  }
  func.func @transform_1(%arg0: i32, %arg1: i32) -> (i32, i32) {
    %c0_i32 = arith.constant 0 : i32
    %c0_i32_0 = arith.constant 0 : i32
    return %arg0, %c0_i32 : i32, i32
  }
}

</mosaic_0001>

<bundles_post_ra>
// kernel: tpu_custom_call.1
= control target key start
LH: loop header
LB: loop body
LE: loop exit
PB: predicated region body
PF: predicated region fallthrough
CT: control target
= control target key end

     0   :  { %6 = vsyncpa [#allocation4], 0  ;;  %s86_s6 = smov [#allocation3]   ;;  %s117_s0 = inlined_call_operand.hbm [shape: f32[16,128], index: 0, kind: input, shape index: {}]   ;;  %s118_s1 = inlined_call_operand.vmem [shape: f32[16,1], index: 1, kind: output, shape index: {}]  }
   0x1   :  { %s15_s7 = sshll.u32 %s86_s6, 4  ;;  %s62_s10 = scalar_lea.hbm %s117_s0, 256  ;;  %s16_s7 = int_to_ptr.vmem [resolvable:$true] %s15_s7 }
   0x2   :  { %p63_p0 = scmp.ne.s32.totalorder %s117_s0, %s62_s10  ;;  %p66_p1 = scmp.lt.u32.totalorder %s62_s10, %s117_s0 }
   0x4   :  { %p68_p2 = pnand %p66_p1, %p63_p0 }
   0x6   :  { %71 = shalt.err (!%p68_p2)
}
   0x7   :  { %s72_s15 = scalar_lea.vmem %s16_s7, 256  ;;  %p77_p4 = scmp.lt.s32.totalorder %s16_s7, %s16_s7 }
   0x8   :  { %p73_p3 = scmp.ne.s32.totalorder %s16_s7, %s72_s15  ;;  %p78_p5 = scmp.lt.s32.totalorder %s72_s15, %s72_s15 }
   0xa   :  { %p79_p6 = por %p78_p5, %p77_p4 }
   0xc   :  { %p80_p7 = pnand %p79_p6, %p73_p3 }
   0xe   :  { %83 = shalt.err (!%p80_p7)
}
   0xf   :  { %s87_s16 = smov 128   ;;  %s88_s17 = smov 8  }
  0x10   :  { %21 = dma.hbm_to_vmem [thread:$0]  %s117_s0, 256, %s16_s7, [#allocation4], %s87_s16, %s87_s16, %s88_s17  }
  0x11   :  { %84 = dma.done.wait [#allocation4], 256  }
  0x12   :  { %85 = vsyncadd [#allocation4], 4294967040  ;;  %v32_v0 = vld [vmem:[#allocation3] sm:$0xff]  ;;  %v33_v1 = vld [vmem:[#allocation3 + $0x8] sm:$0xff]  ;;  %vm51_vm0 = vcmask 7168  }
  0x13   :  { %v34_v2 = vmul.f32 %v32_v0, %v32_v0  ;;  %v35_v3 = vmul.f32 %v33_v1, %v33_v1 }
  0x15   :  { %47 = vadd.xlane.f32.xlu0 %v34_v2 }
  0x19   :  { %49 = vadd.xlane.f32.xlu0 %v35_v3 }
  0xa2   :  { %v48_v4 = vpop.xlane.xlu0 %47 }
  0xa3   :  { %52 = vst.msk [vmem:[%s118_s1] sm:$0xff] %vm51_vm0, %v48_v4 }
  0xa6   :  { %v50_v5 = vpop.xlane.xlu0 %49 }
  0xa7   :  { %53 = vst.msk [vmem:[%s118_s1 + $0x8] sm:$0xff] %vm51_vm0, %v50_v5 }
  0xa8   :  { %58 = vsyncpa [#allocation4], 1 }

</bundles_post_ra>
